<compile_context>
chip_gen: v7x
topology: tpu7x:2x2x1
jax: 0.10.0
libtpu: 0.0.40
codegen_flags: <defaults>
</compile_context>

<pallas_src>
import jax
import jax.numpy as jnp
from jax.experimental import pallas as pl
from jax.experimental.pallas import tpu as pltpu


def _svm_kernel(x_ref, w_ref, b_ref, o_ref):
    # x_ref: (TM, D) caller dtype; w_ref: (1, D) f32; b_ref: (1, 1) f32 in SMEM;
    # o_ref: (1, 1, TM) f32 lane-dense score block.
    x = x_ref[...].astype(jnp.float32)          # no-op for f32 inputs, VPU cast for bf16
    w = w_ref[...]                              # (1, D), broadcasts over rows
    s = jnp.sum(x * w, axis=-1)                 # (TM,) VPU mul + XLU lane reduce, f32 acc
    tm = o_ref.shape[-1]
    o_ref[...] = (s + b_ref[0, 0]).reshape(1, 1, tm)   # lane-dense store


def binary_linear_svm_forward(x, weight, bias):
    """Compute SVM scores = x @ weight.T + bias, returned as shape (batch,).

    Args:
        x:      (batch, input_dim) float32 or bfloat16
        weight: (1, input_dim)  (same layout as torch nn.Linear.weight)
        bias:   (1,)
    """
    batch, input_dim = x.shape

    # Per-row bytes of the f32, lane-padded working set (VMEM/HBM store (8,128) tiles).
    d_pad = ((input_dim + 127) // 128) * 128
    bytes_per_row = d_pad * 4

    # ~4 MiB per x tile (Pallas double-buffers it), rows a multiple of 8.
    tm_budget = max(8, ((4 * 1024 * 1024) // bytes_per_row) // 8 * 8)

    # Keep >= ~4 grid steps when the batch allows it (v7x megacore sharding).
    rows_for_min_steps = max(8, (((batch + 3) // 4) + 7) // 8 * 8)
    tm = min(tm_budget, rows_for_min_steps)

    # Ragged last block handled by Pallas; no jnp.pad copy of x in HBM.
    num_tiles = (batch + tm - 1) // tm

    w_row = weight.reshape(1, input_dim).astype(jnp.float32)   # tiny, resident in VMEM
    b_sc = bias.reshape(1, 1).astype(jnp.float32)              # scalar -> SMEM

    out = pl.pallas_call(
        _svm_kernel,
        out_shape=jax.ShapeDtypeStruct((num_tiles, 1, tm), jnp.float32),
        grid=(num_tiles,),
        in_specs=[
            pl.BlockSpec((tm, input_dim), lambda i: (i, 0)),        # streamed x tiles
            pl.BlockSpec((1, input_dim), lambda i: (0, 0)),         # resident weight row
            pl.BlockSpec(memory_space=pltpu.MemorySpace.SMEM),      # scalar bias
        ],
        out_specs=pl.BlockSpec((1, 1, tm), lambda i: (i, 0, 0)),    # lane-dense scores
        compiler_params=pltpu.CompilerParams(
            dimension_semantics=("parallel",),                      # megacore-shardable
            vmem_limit_bytes=32 * 1024 * 1024,                      # safe on v5e/v6e/v7x
        ),
    )(x, w_row, b_sc)

    return out.reshape(num_tiles * tm)[:batch]   # drop tail, squeeze -> (batch,)


def binary_linear_svm_predict(x, weight, bias):
    """Predict class labels (-1.0 or 1.0), mirroring the PyTorch .predict()."""
    scores = binary_linear_svm_forward(x, weight, bias)
    return jnp.where(scores <= 0, -1.0, 1.0)  # score == 0 -> -1.0, same as torch.where(<=0)


if __name__ == "__main__":
    key = jax.random.PRNGKey(0)
    batch, input_dim = 8, 32

    kx, kw, kb = jax.random.split(key, 3)
    x = jax.random.normal(kx, (batch, input_dim), dtype=jnp.float32)

    # Deterministic nn.Linear-style init: U(-1/sqrt(in_dim), 1/sqrt(in_dim))
    bound = 1.0 / jnp.sqrt(jnp.float32(input_dim))
    weight = jax.random.uniform(kw, (1, input_dim), minval=-bound, maxval=bound,
                                dtype=jnp.float32)
    bias = jax.random.uniform(kb, (1,), minval=-bound, maxval=bound,
                              dtype=jnp.float32)

    def ref_scores(xx):
        return jnp.sum(xx * weight[0], axis=-1) + bias[0]

    # Main forward check (single tile).
    scores = binary_linear_svm_forward(x, weight, bias)
    jax.block_until_ready(scores)
    assert scores.shape == (batch,)
    assert jnp.allclose(scores, ref_scores(x), atol=1e-5, rtol=1e-5)

    # Non-multiple-of-8 batch exercises the ragged (over-read) block path.
    x_odd = jax.random.normal(jax.random.PRNGKey(1), (5, input_dim), dtype=jnp.float32)
    scores_odd = binary_linear_svm_forward(x_odd, weight, bias)
    jax.block_until_ready(scores_odd)
    assert scores_odd.shape == (5,)
    assert jnp.allclose(scores_odd, ref_scores(x_odd), atol=1e-5, rtol=1e-5)

    # Multi-tile grid with a ragged last tile (300 rows -> 4 tiles of 80).
    x_big = jax.random.normal(jax.random.PRNGKey(2), (300, input_dim), dtype=jnp.float32)
    scores_big = binary_linear_svm_forward(x_big, weight, bias)
    jax.block_until_ready(scores_big)
    assert scores_big.shape == (300,)
    assert jnp.allclose(scores_big, ref_scores(x_big), atol=1e-5, rtol=1e-5)

    # Predict check (score <= 0 -> -1.0, else 1.0).
    preds = binary_linear_svm_predict(x, weight, bias)
    jax.block_until_ready(preds)
    assert preds.shape == (batch,)
    assert jnp.allclose(preds, jnp.where(ref_scores(x) <= 0, -1.0, 1.0))

    print("KERNEL_OK")
</pallas_src>

<mosaic_0001>
module attributes {stable_mosaic.version = 11 : i64} {
  func.func @_svm_kernel(%arg0: i32, %arg1: memref<8x32xf32, #tpu.memory_space<vmem>>, %arg2: memref<1x32xf32, #tpu.memory_space<vmem>>, %arg3: memref<1x1xf32, #tpu.memory_space<smem>>, %arg4: memref<1x1x8xf32, #tpu.memory_space<vmem>>) attributes {dimension_semantics = [#tpu.dimension_semantics<parallel>], iteration_bounds = array<i64: 1>, scalar_prefetch = 0 : i64, scratch_operands = 0 : i64, tpu.core_type = #tpu.core_type<tc>, window_params = [{transform_indices = @transform_0, window_bounds = array<i64: 8, 32>}, {pipeline_mode = #tpu.pipeline_mode<synchronous>, transform_indices = @transform_1, window_bounds = array<i64: 1, 32>}, {transform_indices = @transform_2, window_bounds = array<i64: 1, 1>}, {transform_indices = @transform_3, window_bounds = array<i64: 1, 1, 8>}]} {
    %c0 = arith.constant 0 : index
    %c0_0 = arith.constant 0 : index
    %0 = vector.load %arg1[%c0, %c0_0] : memref<8x32xf32, #tpu.memory_space<vmem>>, vector<8x32xf32>
    %c0_1 = arith.constant 0 : index
    %c0_2 = arith.constant 0 : index
    %1 = vector.load %arg2[%c0_1, %c0_2] : memref<1x32xf32, #tpu.memory_space<vmem>>, vector<1x32xf32>
    %2 = vector.broadcast %1 : vector<1x32xf32> to vector<8x32xf32>
    %3 = arith.mulf %0, %2 : vector<8x32xf32>
    %cst = arith.constant dense<0.000000e+00> : vector<8xf32>
    %4 = vector.multi_reduction <add>, %3, %cst [1] : vector<8x32xf32> to vector<8xf32>
    %c0_3 = arith.constant 0 : index
    %c0_4 = arith.constant 0 : index
    %5 = memref.load %arg3[%c0_3, %c0_4] : memref<1x1xf32, #tpu.memory_space<smem>>
    %6 = vector.broadcast %5 : f32 to vector<8xf32>
    %7 = arith.addf %4, %6 : vector<8xf32>
    %8 = vector.shape_cast %7 : vector<8xf32> to vector<1x1x8xf32>
    %c0_5 = arith.constant 0 : index
    %c0_6 = arith.constant 0 : index
    %c0_7 = arith.constant 0 : index
    %9 = vector.load %arg4[%c0_5, %c0_6, %c0_7] : memref<1x1x8xf32, #tpu.memory_space<vmem>>, vector<1x1x8xf32>
    tpu.vector_store %arg4[%c0_5, %c0_6, %c0_7], %8 {strides = array<i32>} : memref<1x1x8xf32, #tpu.memory_space<vmem>>, vector<1x1x8xf32>,
    return
  }
  func.func @transform_0(%arg0: i32) -> (i32, i32) {
    %c0_i32 = arith.constant 0 : i32
    %c0_i32_0 = arith.constant 0 : i32
    return %arg0, %c0_i32 : i32, i32
  }
  func.func @transform_1(%arg0: i32) -> (i32, i32) {
    %c0_i32 = arith.constant 0 : i32
    %c0_i32_0 = arith.constant 0 : i32
    %c0_i32_1 = arith.constant 0 : i32
    return %c0_i32, %c0_i32_0 : i32, i32
  }
  func.func @transform_2(%arg0: i32) -> (i32, i32) {
    %c0_i32 = arith.constant 0 : i32
    %c0_i32_0 = arith.constant 0 : i32
    %c0_i32_1 = arith.constant 0 : i32
    return %c0_i32, %c0_i32_0 : i32, i32
  }
  func.func @transform_3(%arg0: i32) -> (i32, i32, i32) {
    %c0_i32 = arith.constant 0 : i32
    %c0_i32_0 = arith.constant 0 : i32
    %c0_i32_1 = arith.constant 0 : i32
    return %arg0, %c0_i32, %c0_i32_0 : i32, i32, i32
  }
}

</mosaic_0001>

<bundles_post_ra>
// kernel: tpu_custom_call.1
= control target key start
LH: loop header
LB: loop body
LE: loop exit
PB: predicated region body
PF: predicated region fallthrough
CT: control target
= control target key end

     0   :  { %9 = vsyncpa [#allocation4], 0  ;;  %s172_s0 = inlined_call_operand.hbm [shape: f32[8,32], index: 0, kind: input, shape index: {}]   ;;  %s173_s1 = inlined_call_operand.vmem [shape: f32[1,32], index: 1, kind: input, shape index: {}]   ;;  %s174_s2 = inlined_call_operand.<no memory space> [shape: f32[1,1], index: 2, kind: input, shape index: {}]   ;;  %s175_s3 = inlined_call_operand.hbm [shape: f32[1,1,8], index: 3, kind: output, shape index: {}]  }
   0x1   :  { %10 = vsyncpa [#allocation5], 0  ;;  %s120_s12 = smov [#allocation3]   ;;  %s72_s16 = scalar_lea.hbm %s172_s0, 128 }
   0x2   :  { %s17_s13 = sshll.u32 %s120_s12, 4  ;;  %p73_p0 = scmp.ne.s32.totalorder %s172_s0, %s72_s16  ;;  %s18_s13 = int_to_ptr.vmem [resolvable:$true] %s17_s13 }
   0x3   :  { %p76_p1 = scmp.lt.u32.totalorder %s72_s16, %s172_s0 }
   0x5   :  { %p78_p2 = pnand %p76_p1, %p73_p0 }
   0x7   :  { %81 = shalt.err (!%p78_p2)
}
   0x8   :  { %s82_s21 = scalar_lea.vmem %s18_s13, 128  ;;  %p87_p4 = scmp.lt.s32.totalorder %s18_s13, %s18_s13 }
   0x9   :  { %p83_p3 = scmp.ne.s32.totalorder %s18_s13, %s82_s21  ;;  %p88_p5 = scmp.lt.s32.totalorder %s82_s21, %s82_s21 }
   0xb   :  { %p89_p6 = por %p88_p5, %p87_p4 }
   0xd   :  { %p90_p7 = pnand %p89_p6, %p83_p3 }
   0xf   :  { %93 = shalt.err (!%p90_p7)
}
  0x10   :  { %20 = dma.hbm_to_vmem [thread:$0]  %s172_s0, 128, %s18_s13, [#allocation4]  }
  0x11   :  { %116 = dma.done.wait [#allocation4], 128  }
  0x12   :  { %117 = vsyncadd [#allocation4], 4294967168  ;;  %v28_v0 = vld [vmem:[#allocation3] sm:$0xff]  ;;  %vm37_vm0 = vcmask 261120   ;;  %v45_v4 = vlaneseq  ;;  %v42_v7 = vstv %s174_s2  ;;  %s121_s0 = smov [#allocation6]   ;;  %vm52_vm1 = vcmask 57344  }
  0x13   :  { %v69_v1 = vld [vmem:[%s173_s1] ss:$0 sm:$0xff]  ;;  %s60_s28 = sshll.u32 %s121_s0, 4  ;;  %s61_s28 = int_to_ptr.vmem [resolvable:$true] %s60_s28 }
  0x14   :  { %v36_v2 = vmul.f32 %v69_v1, %v28_v0  ;;  %v46_v5 = vand.u32 127, %v45_v4  ;;  %v48_v6 = vshrl.u32 %v45_v4, 7  ;;  %s94_s1 = scalar_lea.vmem %s61_s28, 16  ;;  %s98_s29 = scalar_lea.vmem %s61_s28, 32 }
  0x15   :  { %p95_p8 = scmp.ne.s32.totalorder %s61_s28, %s94_s1  ;;  %p99_p9 = scmp.lt.s32.totalorder %s61_s28, %s61_s28 }
  0x16   :  { %v38_v3 = vsel %vm37_vm0, %v36_v2, 0.0  ;;  %v49_v8 = vsub.s32 %v46_v5, %v48_v6  ;;  %p100_p10 = scmp.lt.s32.totalorder %s98_s29, %s94_s1 }
  0x17   :  { %39 = vadd.xlane.f32.xlu0 %v38_v3 }
  0x18   :  { %p101_p11 = por %p100_p10, %p99_p9 }
  0x1a   :  { %p102_p12 = pnand %p101_p11, %p95_p8 }
  0xa4   :  { %v40_v9 = vpop.xlane.xlu0 %39 }
  0xa5   :  { %v43_v10 = vadd.f32 %v42_v7, %v40_v9 }
  0xa7   :  { %v50_v11 = vrot.slane %v43_v10, %v49_v8 }
  0xa9   :  { %53 = vst.msk [vmem:[#allocation6] sm:$0x1] %vm52_vm1, %v50_v11 }
  0xaa   :  { %105 = shalt.err (!%p102_p12)
}
  0xab   :  { %s106_s2 = scalar_lea.hbm %s175_s3, 16 }
  0xac   :  { %p107_p13 = scmp.ne.s32.totalorder %s175_s3, %s106_s2  ;;  %p110_p0 = scmp.lt.u32.totalorder %s106_s2, %s175_s3 }
  0xae   :  { %p112_p1 = pnand %p110_p0, %p107_p13 }
  0xb0   :  { %115 = shalt.err (!%p112_p1)
}
  0xb1   :  { %63 = dma.vmem_to_hbm [thread:$0]  %s61_s28, 16, %s175_s3, [#allocation5]  }
  0xb2   :  { %118 = dma.done.wait [#allocation5], 16  }
  0xb3   :  { %119 = vsyncadd [#allocation5], 4294967280 }
  0xb4   :  { %67 = vsyncpa [#allocation4], 1 }
  0xb5   :  { %68 = vsyncpa [#allocation5], 1 }

</bundles_post_ra>
